<compile_context>
chip_gen: v6e
topology: v6e:2x2x1
jax: 0.10.0
libtpu: 0.0.40
codegen_flags: <defaults>
</compile_context>

<pallas_src>
import jax
import jax.numpy as jnp
from jax.experimental import pallas as pl
from jax.experimental.pallas import tpu as pltpu

INPUT_SIZE = 784
HIDDEN_SIZE = 100
OUTPUT_SIZE = 10

# Lane-dense padded feature dims (vreg lane width = 128).
HIDDEN_PAD = 128
OUTPUT_PAD = 128


def _mlp_kernel(x_ref, w1_ref, b1_ref, w2_ref, b2_ref, o_ref):
    # Layer 1 on the MXU: bf16 operands, f32 accumulation.
    h = jnp.dot(x_ref[...], w1_ref[...], preferred_element_type=jnp.float32)
    h = h + b1_ref[...]            # [1, HIDDEN_PAD] broadcasts over batch tile
    h = jnp.maximum(h, 0.0)        # ReLU on the VPU (f32)
    # Layer 2: bf16 MXU feed again, f32 accumulation.
    out = jnp.dot(h.astype(jnp.bfloat16), w2_ref[...],
                  preferred_element_type=jnp.float32)
    out = out + b2_ref[...]
    o_ref[...] = out.astype(o_ref.dtype)


def _choose_batch_tile(batch):
    # Prefer 512 rows per step: multiple of 256 keeps the v6e/v7x 2x256^2 MXU
    # full, and 2 x (512*784*2B) bf16 double-buffered x tiles stay far under
    # even v5e's 16 MiB scoped-VMEM default. Small batches use one full tile.
    if batch >= 512:
        return 512
    return max(8, ((batch + 7) // 8) * 8)


@jax.jit
def neural_net_forward(x, w1p, b1p, w2p, b2p):
    """x: [B, 784] f32/bf16; padded params from prepare_params -> [B, 10] f32."""
    batch = x.shape[0]
    tb = _choose_batch_tile(batch)
    b_pad = pl.cdiv(batch, tb) * tb

    x = x.astype(jnp.bfloat16)
    if b_pad != batch:
        x = jnp.pad(x, ((0, b_pad - batch), (0, 0)))

    flops = 2 * b_pad * (INPUT_SIZE * HIDDEN_PAD + HIDDEN_PAD * OUTPUT_PAD)
    bytes_accessed = (b_pad * INPUT_SIZE * 2            # x (bf16)
                      + INPUT_SIZE * HIDDEN_PAD * 2     # w1 (bf16)
                      + HIDDEN_PAD * OUTPUT_PAD * 2     # w2 (bf16)
                      + (HIDDEN_PAD + OUTPUT_PAD) * 4   # biases (f32)
                      + b_pad * OUTPUT_PAD * 4)         # output (f32)

    out_padded = pl.pallas_call(
        _mlp_kernel,
        out_shape=jax.ShapeDtypeStruct((b_pad, OUTPUT_PAD), jnp.float32),
        grid=(b_pad // tb,),
        in_specs=[
            pl.BlockSpec((tb, INPUT_SIZE), lambda i: (i, 0)),          # x tile
            pl.BlockSpec((INPUT_SIZE, HIDDEN_PAD), lambda i: (0, 0)),  # w1 (resident)
            pl.BlockSpec((1, HIDDEN_PAD), lambda i: (0, 0)),           # b1 (resident)
            pl.BlockSpec((HIDDEN_PAD, OUTPUT_PAD), lambda i: (0, 0)),  # w2 (resident)
            pl.BlockSpec((1, OUTPUT_PAD), lambda i: (0, 0)),           # b2 (resident)
        ],
        out_specs=pl.BlockSpec((tb, OUTPUT_PAD), lambda i: (i, 0)),
        compiler_params=pltpu.CompilerParams(
            dimension_semantics=("parallel",)),
        cost_estimate=pl.CostEstimate(
            flops=flops, transcendentals=0, bytes_accessed=bytes_accessed),
    )(x, w1p, b1p, w2p, b2p)

    # Slice off batch padding and the lane padding of the 10-wide output.
    return out_padded[:batch, :OUTPUT_SIZE]


def init_params(key):
    """Deterministic init mimicking nn.Linear's U(-1/sqrt(fan_in), 1/sqrt(fan_in))."""
    k1, k2, k3, k4 = jax.random.split(key, 4)
    bound1 = 1.0 / jnp.sqrt(float(INPUT_SIZE))
    bound2 = 1.0 / jnp.sqrt(float(HIDDEN_SIZE))
    # Stored as [in, out] so the kernel uses x @ W directly.
    w1 = jax.random.uniform(k1, (INPUT_SIZE, HIDDEN_SIZE), jnp.float32,
                            -bound1, bound1)
    b1 = jax.random.uniform(k2, (HIDDEN_SIZE,), jnp.float32, -bound1, bound1)
    w2 = jax.random.uniform(k3, (HIDDEN_SIZE, OUTPUT_SIZE), jnp.float32,
                            -bound2, bound2)
    b2 = jax.random.uniform(k4, (OUTPUT_SIZE,), jnp.float32, -bound2, bound2)
    return w1, b1, w2, b2


def prepare_params(w1, b1, w2, b2):
    """Zero-pad feature dims to 128 lanes and cast weights to bf16."""
    w1p = jnp.zeros((INPUT_SIZE, HIDDEN_PAD), jnp.bfloat16)
    w1p = w1p.at[:, :HIDDEN_SIZE].set(w1.astype(jnp.bfloat16))
    b1p = jnp.zeros((1, HIDDEN_PAD), jnp.float32).at[0, :HIDDEN_SIZE].set(b1)
    w2p = jnp.zeros((HIDDEN_PAD, OUTPUT_PAD), jnp.bfloat16)
    w2p = w2p.at[:HIDDEN_SIZE, :OUTPUT_SIZE].set(w2.astype(jnp.bfloat16))
    b2p = jnp.zeros((1, OUTPUT_PAD), jnp.float32).at[0, :OUTPUT_SIZE].set(b2)
    return w1p, b1p, w2p, b2p


if __name__ == "__main__":
    key = jax.random.PRNGKey(0)
    pkey, xkey = jax.random.split(key)
    w1, b1, w2, b2 = init_params(pkey)
    w1p, b1p, w2p, b2p = prepare_params(w1, b1, w2, b2)

    batch = 8
    x = jax.random.normal(xkey, (batch, INPUT_SIZE), jnp.float32)

    out = neural_net_forward(x, w1p, b1p, w2p, b2p)
    out = jax.block_until_ready(out)
    assert out.shape == (batch, OUTPUT_SIZE)

    # f32 reference of the module's math (loose tol: kernel feeds the MXU bf16).
    ref_f32 = jnp.maximum(x @ w1 + b1, 0.0) @ w2 + b2
    assert jnp.allclose(out, ref_f32, atol=5e-2, rtol=5e-2)

    # bf16 reference reproducing the kernel's numerics (tight tol).
    xb = x.astype(jnp.bfloat16)
    h = jnp.dot(xb, w1.astype(jnp.bfloat16),
                preferred_element_type=jnp.float32) + b1
    h = jnp.maximum(h, 0.0).astype(jnp.bfloat16)
    ref_bf16 = jnp.dot(h, w2.astype(jnp.bfloat16),
                       preferred_element_type=jnp.float32) + b2
    assert jnp.allclose(out, ref_bf16, atol=2e-3, rtol=2e-3)

    print("KERNEL_OK")
</pallas_src>

<mosaic_0001>
module attributes {stable_mosaic.version = 11 : i64} {
  func.func @_mlp_kernel(%arg0: i32, %arg1: memref<8x784xbf16, #tpu.memory_space<vmem>>, %arg2: memref<784x128xbf16, #tpu.memory_space<vmem>>, %arg3: memref<1x128xf32, #tpu.memory_space<vmem>>, %arg4: memref<128x128xbf16, #tpu.memory_space<vmem>>, %arg5: memref<1x128xf32, #tpu.memory_space<vmem>>, %arg6: memref<8x128xf32, #tpu.memory_space<vmem>>) attributes {dimension_semantics = [#tpu.dimension_semantics<parallel>], iteration_bounds = array<i64: 1>, scalar_prefetch = 0 : i64, scratch_operands = 0 : i64, tpu.core_type = #tpu.core_type<tc>, window_params = [{transform_indices = @transform_0, window_bounds = array<i64: 8, 784>}, {pipeline_mode = #tpu.pipeline_mode<synchronous>, transform_indices = @transform_1, window_bounds = array<i64: 784, 128>}, {pipeline_mode = #tpu.pipeline_mode<synchronous>, transform_indices = @transform_2, window_bounds = array<i64: 1, 128>}, {pipeline_mode = #tpu.pipeline_mode<synchronous>, transform_indices = @transform_3, window_bounds = array<i64: 128, 128>}, {pipeline_mode = #tpu.pipeline_mode<synchronous>, transform_indices = @transform_4, window_bounds = array<i64: 1, 128>}, {transform_indices = @transform_5, window_bounds = array<i64: 8, 128>}]} {
    %c0 = arith.constant 0 : index
    %c0_0 = arith.constant 0 : index
    %0 = vector.load %arg1[%c0, %c0_0] : memref<8x784xbf16, #tpu.memory_space<vmem>>, vector<8x784xbf16>
    %c0_1 = arith.constant 0 : index
    %c0_2 = arith.constant 0 : index
    %1 = vector.load %arg2[%c0_1, %c0_2] : memref<784x128xbf16, #tpu.memory_space<vmem>>, vector<784x128xbf16>
    %cst = arith.constant dense<0.000000e+00> : vector<8x128xf32>
    %2 = tpu.matmul %0, %1, %cst {dimension_numbers = #tpu.dot_dimension_numbers<[1], [0], [0], [1], [0, 0, 1, 1], [], []>} : vector<8x784xbf16>, vector<784x128xbf16>, vector<8x128xf32> -> vector<8x128xf32>
    %c0_3 = arith.constant 0 : index
    %c0_4 = arith.constant 0 : index
    %3 = vector.load %arg3[%c0_3, %c0_4] : memref<1x128xf32, #tpu.memory_space<vmem>>, vector<1x128xf32>
    %4 = vector.broadcast %3 : vector<1x128xf32> to vector<8x128xf32>
    %5 = arith.addf %2, %4 : vector<8x128xf32>
    %cst_5 = arith.constant 0.000000e+00 : f32
    %6 = vector.broadcast %cst_5 : f32 to vector<8x128xf32>
    %7 = arith.maximumf %5, %6 : vector<8x128xf32>
    %8 = arith.truncf %7 : vector<8x128xf32> to vector<8x128xbf16>
    %c0_6 = arith.constant 0 : index
    %c0_7 = arith.constant 0 : index
    %9 = vector.load %arg4[%c0_6, %c0_7] : memref<128x128xbf16, #tpu.memory_space<vmem>>, vector<128x128xbf16>
    %cst_8 = arith.constant dense<0.000000e+00> : vector<8x128xf32>
    %10 = tpu.matmul %8, %9, %cst_8 {dimension_numbers = #tpu.dot_dimension_numbers<[1], [0], [0], [1], [0, 0, 1, 1], [], []>} : vector<8x128xbf16>, vector<128x128xbf16>, vector<8x128xf32> -> vector<8x128xf32>
    %c0_9 = arith.constant 0 : index
    %c0_10 = arith.constant 0 : index
    %11 = vector.load %arg5[%c0_9, %c0_10] : memref<1x128xf32, #tpu.memory_space<vmem>>, vector<1x128xf32>
    %12 = vector.broadcast %11 : vector<1x128xf32> to vector<8x128xf32>
    %13 = arith.addf %10, %12 : vector<8x128xf32>
    %c0_11 = arith.constant 0 : index
    %c0_12 = arith.constant 0 : index
    %14 = vector.load %arg6[%c0_11, %c0_12] : memref<8x128xf32, #tpu.memory_space<vmem>>, vector<8x128xf32>
    tpu.vector_store %arg6[%c0_11, %c0_12], %13 {strides = array<i32>} : memref<8x128xf32, #tpu.memory_space<vmem>>, vector<8x128xf32>,
    return
  }
  func.func @transform_0(%arg0: i32) -> (i32, i32) {
    %c0_i32 = arith.constant 0 : i32
    %c0_i32_0 = arith.constant 0 : i32
    return %arg0, %c0_i32 : i32, i32
  }
  func.func @transform_1(%arg0: i32) -> (i32, i32) {
    %c0_i32 = arith.constant 0 : i32
    %c0_i32_0 = arith.constant 0 : i32
    %c0_i32_1 = arith.constant 0 : i32
    return %c0_i32, %c0_i32_0 : i32, i32
  }
  func.func @transform_2(%arg0: i32) -> (i32, i32) {
    %c0_i32 = arith.constant 0 : i32
    %c0_i32_0 = arith.constant 0 : i32
    %c0_i32_1 = arith.constant 0 : i32
    return %c0_i32, %c0_i32_0 : i32, i32
  }
  func.func @transform_3(%arg0: i32) -> (i32, i32) {
    %c0_i32 = arith.constant 0 : i32
    %c0_i32_0 = arith.constant 0 : i32
    %c0_i32_1 = arith.constant 0 : i32
    return %c0_i32, %c0_i32_0 : i32, i32
  }
  func.func @transform_4(%arg0: i32) -> (i32, i32) {
    %c0_i32 = arith.constant 0 : i32
    %c0_i32_0 = arith.constant 0 : i32
    %c0_i32_1 = arith.constant 0 : i32
    return %c0_i32, %c0_i32_0 : i32, i32
  }
  func.func @transform_5(%arg0: i32) -> (i32, i32) {
    %c0_i32 = arith.constant 0 : i32
    %c0_i32_0 = arith.constant 0 : i32
    return %arg0, %c0_i32 : i32, i32
  }
}

</mosaic_0001>

<bundles_post_ra>
// kernel: neural_net_forward.1
= control target key start
LH: loop header
LB: loop body
LE: loop exit
PB: predicated region body
PF: predicated region fallthrough
CT: control target
= control target key end

     0   :  { %10 = vsyncpa [#allocation3], 0  ;;  %s1126_s0 = inlined_call_operand.vmem [shape: bf16[8,784], index: 0, kind: input, shape index: {}]   ;;  %s1127_s1 = inlined_call_operand.hbm [shape: bf16[784,128], index: 1, kind: input, shape index: {}]   ;;  %s1128_s2 = inlined_call_operand.vmem [shape: f32[1,128], index: 2, kind: input, shape index: {}]   ;;  %s1129_s3 = inlined_call_operand.vmem [shape: bf16[128,128], index: 3, kind: input, shape index: {}]   ;;  %s1130_s4 = inlined_call_operand.vmem [shape: f32[1,128], index: 4, kind: input, shape index: {}]   ;;  %s1131_s5 = inlined_call_operand.hbm [shape: f32[8,128], index: 5, kind: output, shape index: {}]  }
   0x1   :  { %11 = vsyncpa [#allocation4], 0  ;;  %s1040_s18 = smov [#allocation2]  }
   0x2   :  { %s19_s19 = sshll.u32 %s1040_s18, 4  ;;  %s20_s19 = int_to_ptr.vmem [resolvable:$true] %s19_s19 }
   0x3   :  { %s1004_s20 = scalar_lea.vmem %s20_s19, 6272  ;;  %p1009_p1 = scmp.lt.s32.totalorder %s20_s19, %s20_s19 }
   0x4   :  { %p1005_p0 = scmp.ne.s32.totalorder %s20_s19, %s1004_s20  ;;  %p1010_p2 = scmp.lt.s32.totalorder %s1004_s20, %s1004_s20 }
   0x6   :  { %p1011_p3 = por %p1010_p2, %p1009_p1 }
   0x8   :  { %p1012_p4 = pnand %p1011_p3, %p1005_p0 }
   0xa   :  { %1015 = shalt.err (!%p1012_p4)
}
   0xb   :  { %s1041_s21 = smov 64   ;;  %s1042_s22 = smov 4  }
   0xc   :  { %25 = dma.hbm_to_vmem [thread:$0]  %s1127_s1, 6272, %s20_s19, [#allocation3], %s1041_s21, %s1041_s21, %s1042_s22  }
   0xd   :  { %1036 = dma.done.wait [#allocation3], 6272  }
   0xe   :  { %1037 = vsyncadd [#allocation3], 4294961024  ;;  %v932_v0 = vld [vmem:[#allocation2 + $0x78] sm:$0xff]   ;;  %v936_v4 = vld [vmem:[#allocation2 + $0x70] sm:$0xff]   ;;  %v1043_v43 = vmov 0.0   ;;  %vm1044_vm0 = vmmov 0  }
   0xf   :  { %v933_v1 = vld [vmem:[#allocation2 + $0x38] sm:$0xff]   ;;  %823 = vmatprep.subr.bf16.mxu0 %v932_v0  ;;  %v937_v5 = vld [vmem:[#allocation2 + $0x30] sm:$0xff]   ;;  %v940_v8 = vld [vmem:[#allocation2 + $0x68] sm:$0xff]   ;;  %vm463_vm1 = vcmask 130048   ;;  %s1045_s1 = smov [#allocation5]  }
  0x10   :  { %v934_v2 = vld [vmem:[#allocation2 + $0xf8] sm:$0xff]   ;;  %824 = vmatpush3.bf16.msra.mxu0 %v933_v1  ;;  %v938_v6 = vld [vmem:[#allocation2 + $0xf0] sm:$0xff]   ;;  %v941_v9 = vld [vmem:[#allocation2 + $0x28] sm:$0xff]   ;;  %s747_s25 = sshll.u32 %s1045_s1, 4  ;;  %s748_s25 = int_to_ptr.vmem [resolvable:$true] %s747_s25 }
  0x11   :  { %v935_v3 = vld [vmem:[#allocation2 + $0xb8] sm:$0xff]   ;;  %845 = vmatprep.subr.bf16.mxu1 %v934_v2  ;;  %825 = vmatprep.subr.bf16.mxu0 %v936_v4  ;;  %v939_v7 = vld [vmem:[#allocation2 + $0xb0] sm:$0xff]   ;;  %v942_v10 = vld [vmem:[#allocation2 + $0xe8] sm:$0xff]   ;;  %p1021_p6 = scmp.lt.s32.totalorder %s748_s25, %s748_s25 }
  0x12   :  { %846 = vmatpush3.bf16.msra.mxu1 %v935_v3  ;;  %v943_v11 = vld [vmem:[#allocation2 + $0xa8] sm:$0xff]   ;;  %v944_v12 = vld [vmem:[#allocation2 + $0x60] sm:$0xff]   ;;  %v948_v16 = vld [vmem:[#allocation2 + $0x58] sm:$0xff]  }
  0x13   :  { %847 = vmatprep.subr.bf16.mxu1 %v938_v6  ;;  %v945_v13 = vld [vmem:[#allocation2 + $0x20] sm:$0xff]   ;;  %v949_v17 = vld [vmem:[#allocation2 + $0x18] sm:$0xff]   ;;  %v952_v20 = vld [vmem:[#allocation2 + $0x50] sm:$0xff]  }
  0x14   :  { %826 = vmatpush3.bf16.msra.mxu0 %v937_v5  ;;  %v946_v14 = vld [vmem:[#allocation2 + $0xe0] sm:$0xff]   ;;  %v950_v18 = vld [vmem:[#allocation2 + $0xd8] sm:$0xff]   ;;  %v953_v21 = vld [vmem:[#allocation2 + $0x10] sm:$0xff]  }
  0x15   :  { %827 = vmatprep.subr.bf16.mxu0 %v940_v8  ;;  %v947_v15 = vld [vmem:[#allocation2 + $0xa0] sm:$0xff]   ;;  %v951_v19 = vld [vmem:[#allocation2 + $0x98] sm:$0xff]   ;;  %v954_v22 = vld [vmem:[#allocation2 + $0xd0] sm:$0xff]  }
  0x16   :  { %848 = vmatpush3.bf16.msra.mxu1 %v939_v7  ;;  %v955_v23 = vld [vmem:[#allocation2 + $0x90] sm:$0xff]   ;;  %v956_v24 = vld [vmem:[#allocation2 + $0x48] sm:$0xff]   ;;  %v960_v28 = vld [vmem:[#allocation2 + $0x40] sm:$0xff]  }
  0x17   :  { %849 = vmatprep.subr.bf16.mxu1 %v942_v10  ;;  %v957_v25 = vld [vmem:[#allocation2 + $0x8] sm:$0xff]   ;;  %v961_v29 = vld [vmem:[#allocation2] sm:$0xff]   ;;  %v966_v35 = vld [vmem:[#allocation2 + $0x178] sm:$0xff]  }
  0x18   :  { %828 = vmatpush3.bf16.msra.mxu0 %v941_v9  ;;  %v958_v26 = vld [vmem:[#allocation2 + $0xc8] sm:$0xff]   ;;  %v962_v30 = vld [vmem:[#allocation2 + $0xc0] sm:$0xff]   ;;  %v969_v39 = vld [vmem:[#allocation2 + $0x138] sm:$0xff]  }
  0x19   :  { %829 = vmatprep.subr.bf16.mxu0 %v944_v12  ;;  %v959_v27 = vld [vmem:[#allocation2 + $0x88] sm:$0xff]   ;;  %v36_v31 = vld [vmem:[%s1126_s0] sm:$0xff]  ;;  %v970_v40 = vld [vmem:[#allocation2 + $0x170] sm:$0xff]  }
  0x1a   :  { %850 = vmatpush3.bf16.msra.mxu1 %v943_v11  ;;  %v757_v32 = vcombine.low %v36_v31, %v36_v31  ;;  %v758_v33 = vcombine.high %v36_v31, %v36_v31  ;;  %v965_v34 = vld [vmem:[#allocation2 + $0x80] sm:$0xff]   ;;  %v37_v36 = vld [vmem:[%s1126_s0 + $0x8] sm:$0xff]  ;;  %v971_v41 = vld [vmem:[#allocation2 + $0x130] sm:$0xff]  }
  0x1b   :  { %851 = vmatprep.subr.bf16.mxu1 %v946_v14  ;;  %v759_v37 = vcombine.low %v37_v36, %v37_v36  ;;  %v760_v38 = vcombine.high %v37_v36, %v37_v36  ;;  %v972_v42 = vld [vmem:[#allocation2 + $0x168] sm:$0xff]   ;;  %v974_v45 = vld [vmem:[#allocation2 + $0x160] sm:$0xff]   ;;  %v976_v47 = vld [vmem:[#allocation2 + $0x158] sm:$0xff]  }
  0x1c   :  { %830 = vmatpush3.bf16.msra.mxu0 %v945_v13  ;;  %499 = vmatprep.mubr.bf16.mxu0 %v758_v33  ;;  %v973_v44 = vld [vmem:[#allocation2 + $0x128] sm:$0xff]   ;;  %v975_v46 = vld [vmem:[#allocation2 + $0x120] sm:$0xff]   ;;  %v977_v48 = vld [vmem:[#allocation2 + $0x118] sm:$0xff]  }
  0x1d   :  { %831 = vmatprep.subr.bf16.mxu0 %v948_v16  ;;  %539 = vmatprep.mubr.bf16.mxu1 %v760_v38  ;;  %v978_v49 = vld [vmem:[#allocation2 + $0x150] sm:$0xff]   ;;  %v984_v50 = vld [vmem:[#allocation2 + $0x180] sm:$0xff]   ;;  %v987_v54 = vld [vmem:[%s1126_s0 + $0x18] ss:$0 sps:$4 sm:$0xff]  }
  0x1e   :  { %852 = vmatpush3.bf16.msra.mxu1 %v947_v15  ;;  %v38_v51 = vld [vmem:[%s1126_s0 + $0x10] sm:$0xff]  ;;  %v980_v55 = vld [vmem:[#allocation2 + $0x148] sm:$0xff]   ;;  %v982_v57 = vld [vmem:[#allocation2 + $0x140] sm:$0xff]  }
  0x1f   :  { %853 = vmatprep.subr.bf16.mxu1 %v950_v18  ;;  %v979_v52 = vld [vmem:[#allocation2 + $0x110] sm:$0xff]   ;;  %v762_v53 = vcombine.high %v38_v51, %v38_v51  ;;  %v981_v56 = vld [vmem:[#allocation2 + $0x108] sm:$0xff]   ;;  %v983_v58 = vld [vmem:[#allocation2 + $0x100] sm:$0xff]   ;;  %v761_v59 = vcombine.low %v38_v51, %v38_v51 }
  0x20   :  { %832 = vmatpush3.bf16.msra.mxu0 %v949_v17  ;;  %v988_v60 = vld [vmem:[%s1129_s3 + $0x38] sm:$0xff]   ;;  %v989_v61 = vld [vmem:[%s1129_s3 + $0x30] sm:$0xff]   ;;  %v990_v62 = vld [vmem:[%s1129_s3 + $0x28] sm:$0xff]  }
  0x21   :  { %833 = vmatprep.subr.bf16.mxu0 %v952_v20  ;;  %v991_v63 = vld [vmem:[%s1129_s3 + $0x20] sm:$0xff]   ;;  %v992_v0 = vld [vmem:[%s1129_s3 + $0x18] sm:$0xff]   ;;  %v993_v1 = vld [vmem:[%s1129_s3 + $0x10] sm:$0xff]  }
  0x22   :  { %854 = vmatpush3.bf16.msra.mxu1 %v951_v19  ;;  %v994_v2 = vld [vmem:[%s1129_s3 + $0x8] sm:$0xff]   ;;  %v995_v3 = vld [vmem:[%s1129_s3] sm:$0xff]  }
  0x23   :  { %855 = vmatprep.subr.bf16.mxu1 %v954_v22  ;;  %v756_v17 = vld [vmem:[%s1128_s2] ss:$0 sm:$0xff]  ;;  %s1016_s2 = scalar_lea.vmem %s748_s25, 128 }
  0x24   :  { %834 = vmatpush3.bf16.msra.mxu0 %v953_v21  ;;  %p1017_p5 = scmp.ne.s32.totalorder %s748_s25, %s1016_s2  ;;  %p1022_p7 = scmp.lt.s32.totalorder %s1016_s2, %s1016_s2 }
  0x25   :  { %835 = vmatprep.subr.bf16.mxu0 %v956_v24 }
  0x26   :  { %856 = vmatpush3.bf16.msra.mxu1 %v955_v23  ;;  %p1023_p8 = por %p1022_p7, %p1021_p6 }
  0x27   :  { %857 = vmatprep.subr.bf16.mxu1 %v958_v26 }
  0x28   :  { %836 = vmatpush3.bf16.msra.mxu0 %v957_v25  ;;  %p1024_p9 = pnand %p1023_p8, %p1017_p5 }
  0x29   :  { %837 = vmatprep.subr.bf16.mxu0 %v960_v28 }
  0x2a   :  { %858 = vmatpush3.bf16.msra.mxu1 %v959_v27 }
  0x2b   :  { %859 = vmatprep.subr.bf16.mxu1 %v962_v30  ;;  %v814_v30 = vld [vmem:[%s1130_s4] ss:$0 sm:$0xff] }
  0x2c   :  { %838 = vmatpush3.bf16.msra.mxu0 %v961_v29 }
  0x2d   :  { %867 = vmatprep.subr.bf16.mxu0 %v966_v35 }
  0x2e   :  { %860 = vmatpush3.bf16.msra.mxu1 %v965_v34 }
  0x2f   :  { %500 = vmatmul.mubr.bf16.vlgmr.msra.gmra.mxu0 %v757_v32  ;;  %900 = vmatprep.subr.bf16.mxu1 %v1043_v43 }
  0x30   :  { %868 = vmatpush3.bf16.msra.mxu0 %v969_v39  ;;  %579 = vmatprep.mubr.bf16.mxu0 %v762_v53 }
  0x31   :  { %540 = vmatmul.mubr.bf16.vlgmr.msra.gmra.mxu1 %v759_v37  ;;  %869 = vmatprep.subr.bf16.mxu0 %v970_v40 }
  0x32   :  { %902 = vmatprep.mubr.msk.bf16.mxu1 %vm1044_vm0, %v1043_v43  ;;  %901 = vmatpush3.bf16.msra.mxu1 %v984_v50 }
  0x33   :  { %906 = vmatprep.subr.bf16.mxu1 %v1043_v43 }
  0x34   :  { %870 = vmatpush3.bf16.msra.mxu0 %v971_v41 }
  0x35   :  { %871 = vmatprep.subr.bf16.mxu0 %v972_v42 }
  0x38   :  { %872 = vmatpush3.bf16.msra.mxu0 %v973_v44 }
  0x39   :  { %873 = vmatprep.subr.bf16.mxu0 %v974_v45  ;;  %903 = vmatmul.mubr.msk.bf16.vlgmr.msra.gmra.mxu1 %vm463_vm1, %v987_v54 }
  0x3a   :  { %922 = vmatprep.mubr.msk.bf16.mxu1 %vm1044_vm0, %v1043_v43  ;;  %907 = vmatpush3.bf16.msra.mxu1 %v988_v60 }
  0x3b   :  { %908 = vmatprep.subr.bf16.mxu1 %v1043_v43 }
  0x3c   :  { %874 = vmatpush3.bf16.msra.mxu0 %v975_v46 }
  0x3d   :  { %875 = vmatprep.subr.bf16.mxu0 %v976_v47 }
  0x3e   :  { %909 = vmatpush3.bf16.msra.mxu1 %v989_v61 }
  0x3f   :  { %910 = vmatprep.subr.bf16.mxu1 %v1043_v43 }
  0x40   :  { %876 = vmatpush3.bf16.msra.mxu0 %v977_v48 }
  0x41   :  { %877 = vmatprep.subr.bf16.mxu0 %v978_v49 }
  0x42   :  { %911 = vmatpush3.bf16.msra.mxu1 %v990_v62 }
  0x43   :  { %912 = vmatprep.subr.bf16.mxu1 %v1043_v43 }
  0x44   :  { %878 = vmatpush3.bf16.msra.mxu0 %v979_v52 }
  0x45   :  { %879 = vmatprep.subr.bf16.mxu0 %v980_v55 }
  0x46   :  { %913 = vmatpush3.bf16.msra.mxu1 %v991_v63 }
  0x47   :  { %914 = vmatprep.subr.bf16.mxu1 %v1043_v43 }
  0x48   :  { %880 = vmatpush3.bf16.msra.mxu0 %v981_v56 }
  0x49   :  { %881 = vmatprep.subr.bf16.mxu0 %v982_v57 }
  0x4a   :  { %915 = vmatpush3.bf16.msra.mxu1 %v992_v0 }
  0x4b   :  { %916 = vmatprep.subr.bf16.mxu1 %v1043_v43 }
  0x4c   :  { %882 = vmatpush3.bf16.msra.mxu0 %v983_v58 }
  0x4e   :  { %917 = vmatpush3.bf16.msra.mxu1 %v993_v1 }
  0x4f   :  { %580 = vmatmul.mubr.bf16.vlgmr.msra.gmra.mxu0 %v761_v59  ;;  %918 = vmatprep.subr.bf16.mxu1 %v1043_v43 }
  0x52   :  { %919 = vmatpush3.bf16.msra.mxu1 %v994_v2 }
  0x53   :  { %920 = vmatprep.subr.bf16.mxu1 %v1043_v43 }
  0x56   :  { %921 = vmatpush3.bf16.msra.mxu1 %v995_v3 }
  0xef   :  { %v839_v4 = vpop.f32.mrf.mxu0 }
  0xf1   :  { %v840_v5 = vpop.f32.mrf.mxu0  ;;  %v861_v6 = vpop.f32.mrf.mxu1 }
  0xf2   :  { %v841_v16 = vadd.f32 %v840_v5, %v839_v4 }
  0xf3   :  { %v842_v7 = vpop.f32.mrf.mxu0  ;;  %v862_v8 = vpop.f32.mrf.mxu1 }
  0xf4   :  { %v502_v18 = vadd.f32 %v841_v16, %v756_v17  ;;  %v863_v19 = vadd.f32 %v862_v8, %v861_v6 }
  0xf5   :  { %v843_v9 = vpop.f32.mrf.mxu0  ;;  %v864_v10 = vpop.f32.mrf.mxu1 }
  0xf6   :  { %v542_v22 = vadd.f32 %v863_v19, %v502_v18 }
  0xf7   :  { %v865_v11 = vpop.f32.mrf.mxu1 }
  0xf9   :  { %v621_v12 = vpop.f32.mrf.mxu1 }
  0xfb   :  { %v904_v13 = vpop.f32.mrf.mxu1 }
  0xfd   :  { %v624_v14 = vpop.f32.mrf.mxu1 }
  0xff   :  { %v905_v15 = vpop.f32.mrf.mxu1 }
 0x10f   :  { %v883_v20 = vpop.f32.mrf.mxu0 }
 0x111   :  { %v884_v21 = vpop.f32.mrf.mxu0 }
 0x112   :  { %v885_v23 = vadd.f32 %v884_v21, %v883_v20 }
 0x113   :  { %v886_v24 = vpop.f32.mrf.mxu0 }
 0x114   :  { %v582_v25 = vadd.f32 %v885_v23, %v542_v22 }
 0x115   :  { %v887_v26 = vpop.f32.mrf.mxu0 }
 0x116   :  { %v622_v27 = vadd.f32 %v621_v12, %v582_v25 }
 0x118   :  { %v627_v28 = vmax.f32 %v622_v27, 0.0 }
 0x11a   :  { %v628_v29 = vpack.c.bf16 %v627_v28, %v627_v28 }
 0x11c   :  { %923 = vmatmul.mubr.bf16.vlgmr.msra.gmra.mxu1 %v628_v29 }
 0x1dc   :  { %v734_v31 = vpop.f32.mrf.mxu1 }
 0x1dd   :  { %v735_v32 = vadd.f32 %v814_v30, %v734_v31 }
 0x1de   :  { %v924_v33 = vpop.f32.mrf.mxu1 }
 0x1df   :  { %740 = vst [vmem:[#allocation5] sm:$0xff] %v735_v32 }
 0x1e0   :  { %v737_v34 = vpop.f32.mrf.mxu1 }
 0x1e1   :  { %1027 = shalt.err (!%p1024_p9)
}
 0x1e2   :  { %750 = dma.vmem_to_hbm [thread:$0]  %s748_s25, 128, %s1131_s5, [#allocation4]   ;;  %v925_v35 = vpop.f32.mrf.mxu1 }
 0x1e3   :  { %1038 = dma.done.wait [#allocation4], 128  }
 0x1e4   :  { %1039 = vsyncadd [#allocation4], 4294967168 }
 0x1e5   :  { %754 = vsyncpa [#allocation3], 1 }
 0x1e6   :  { %755 = vsyncpa [#allocation4], 1 }

</bundles_post_ra>
